<compile_context>
chip_gen: v5e
topology: v5e:2x2
jax: 0.10.0
libtpu: 0.0.40
codegen_flags: <defaults>
</compile_context>

<pallas_src>
import math

import jax
import jax.numpy as jnp
from jax.experimental import pallas as pl
from jax.experimental.pallas import tpu as pltpu


def _mlp_kernel(x_ref, w1_ref, b1_ref, w2_ref, b2_ref, w3_ref, b3_ref, o_ref):
    # fc1: bf16 x @ bf16 w1 on the MXU, f32 accumulation; bias + ReLU on the VPU.
    h1 = jnp.dot(x_ref[...], w1_ref[...], preferred_element_type=jnp.float32)
    h1 = jnp.maximum(h1 + b1_ref[...], 0.0)

    # fc2: cast activations back to bf16 for the MXU, accumulate in f32.
    h2 = jnp.dot(h1.astype(w2_ref.dtype), w2_ref[...],
                 preferred_element_type=jnp.float32)
    h2 = jnp.maximum(h2 + b2_ref[...], 0.0)

    # fc3 (single output column): VPU multiply + XLU lane reduction instead of
    # a 1-column MXU matmul that would waste 255/256 of the systolic array.
    logits = jnp.sum(h2 * w3_ref[...], axis=-1, keepdims=True) + b3_ref[...]

    # Sigmoid: exp goes to the EUP (separate bundle slot), rest on the VPU.
    o_ref[...] = 1.0 / (1.0 + jnp.exp(-logits))


def _round_up(x, m):
    return ((x + m - 1) // m) * m


def neural_network_forward(x, w1, b1, w2, b2, w3, b3, *, block_b=1024):
    """Full MLP forward pass as a single batch-tiled Pallas TPU kernel.

    x:  (B, n_in) float32
    w1: (n_in, 640) b1: (1, 640)
    w2: (640, 256)  b2: (1, 256)
    w3: (256, 1)    b3: (1, 1)
    returns (B, 1) float32  == sigmoid(fc3(relu(fc2(relu(fc1(x))))))
    """
    B, n_in = x.shape
    h1_dim, h2_dim = w1.shape[1], w2.shape[1]

    # bf16 streaming for the large operands; f32 accumulation in-kernel.
    x_bf = x.astype(jnp.bfloat16)
    w1_bf = w1.astype(jnp.bfloat16)
    w2_bf = w2.astype(jnp.bfloat16)
    b1_f = b1.astype(jnp.float32)
    b2_f = b2.astype(jnp.float32)
    # fc3 weight as a lane-dense (1, 256) f32 row for the VPU/XLU path.
    w3_row = w3.reshape(1, h2_dim).astype(jnp.float32)
    b3_f = b3.astype(jnp.float32)

    # Batch tile: multiple of 8 sublanes, capped so the per-step VMEM footprint
    # stays at a few MiB on every generation (v5e/v6e 128 MiB, v7x 64 MiB).
    tb = max(8, min(_round_up(block_b, 8), _round_up(B, 8)))
    num_tiles = pl.cdiv(B, tb)
    b_pad = num_tiles * tb
    if b_pad != B:
        x_bf = jnp.pad(x_bf, ((0, b_pad - B), (0, 0)))

    flops = 2 * B * (n_in * h1_dim + h1_dim * h2_dim + h2_dim)
    bytes_accessed = (
        x_bf.size * 2 + w1_bf.size * 2 + w2_bf.size * 2
        + (b1_f.size + b2_f.size + w3_row.size + b3_f.size) * 4
        + b_pad * 4
    )
    cost = pl.CostEstimate(flops=flops, transcendentals=B,
                           bytes_accessed=bytes_accessed)

    out = pl.pallas_call(
        _mlp_kernel,
        out_shape=jax.ShapeDtypeStruct((b_pad, 1), jnp.float32),
        grid=(num_tiles,),
        in_specs=[
            pl.BlockSpec((tb, n_in), lambda i: (i, 0)),    # x: tiled over batch
            pl.BlockSpec(w1_bf.shape, lambda i: (0, 0)),   # weights / biases:
            pl.BlockSpec(b1_f.shape, lambda i: (0, 0)),    #   constant block idx
            pl.BlockSpec(w2_bf.shape, lambda i: (0, 0)),   #   -> fetched once,
            pl.BlockSpec(b2_f.shape, lambda i: (0, 0)),    #   VMEM-resident
            pl.BlockSpec(w3_row.shape, lambda i: (0, 0)),
            pl.BlockSpec(b3_f.shape, lambda i: (0, 0)),
        ],
        out_specs=pl.BlockSpec((tb, 1), lambda i: (i, 0)),
        compiler_params=pltpu.CompilerParams(
            dimension_semantics=("parallel",),   # megacore sharding where available
            vmem_limit_bytes=32 << 20,           # modest, portable VMEM budget
        ),
        cost_estimate=cost,
    )(x_bf, w1_bf, b1_f, w2_bf, b2_f, w3_row, b3_f)

    return out[:B]


def init_params(key, n_in):
    """Deterministic parameter init mirroring the PyTorch module:
    xavier_uniform_ for weights, default Linear uniform(-1/sqrt(fan_in), ..)
    for biases. Weights stored as (in, out) — transposed vs torch's (out, in)."""
    def xavier_uniform(k, fan_in, fan_out):
        limit = math.sqrt(6.0 / (fan_in + fan_out))
        return jax.random.uniform(k, (fan_in, fan_out), jnp.float32, -limit, limit)

    def bias_init(k, fan_in, fan_out):
        bound = 1.0 / math.sqrt(fan_in)
        return jax.random.uniform(k, (1, fan_out), jnp.float32, -bound, bound)

    k1, k2, k3, k4, k5, k6 = jax.random.split(key, 6)
    w1 = xavier_uniform(k1, n_in, 640)
    b1 = bias_init(k2, n_in, 640)
    w2 = xavier_uniform(k3, 640, 256)
    b2 = bias_init(k4, 640, 256)
    w3 = xavier_uniform(k5, 256, 1)
    b3 = bias_init(k6, 256, 1)
    return w1, b1, w2, b2, w3, b3


if __name__ == "__main__":
    key = jax.random.PRNGKey(0)
    k_x, k_p = jax.random.split(key)

    B, n_in = 8, 32  # small shapes; n_in is the module's constructor arg
    x = jax.random.normal(k_x, (B, n_in), jnp.float32)
    params = init_params(k_p, n_in)

    out = neural_network_forward(x, *params)
    out = jax.block_until_ready(out)

    # Sanity check against a pure-f32 JAX reference (tolerance relaxed because
    # the kernel streams x/w1/w2 in bf16 with f32 accumulation).
    w1, b1, w2, b2, w3, b3 = params
    ref = jnp.maximum(x @ w1 + b1, 0.0)
    ref = jnp.maximum(ref @ w2 + b2, 0.0)
    ref = jax.nn.sigmoid(ref @ w3 + b3)
    assert out.shape == (B, 1)
    assert jnp.allclose(out, ref, atol=2e-2), "mismatch vs reference"

    print("KERNEL_OK")
</pallas_src>

<mosaic_0001>
module attributes {stable_mosaic.version = 11 : i64} {
  func.func @_mlp_kernel(%arg0: i32, %arg1: memref<8x32xbf16, #tpu.memory_space<vmem>>, %arg2: memref<32x640xbf16, #tpu.memory_space<vmem>>, %arg3: memref<1x640xf32, #tpu.memory_space<vmem>>, %arg4: memref<640x256xbf16, #tpu.memory_space<vmem>>, %arg5: memref<1x256xf32, #tpu.memory_space<vmem>>, %arg6: memref<1x256xf32, #tpu.memory_space<vmem>>, %arg7: memref<1x1xf32, #tpu.memory_space<vmem>>, %arg8: memref<8x1xf32, #tpu.memory_space<vmem>>) attributes {dimension_semantics = [#tpu.dimension_semantics<parallel>], iteration_bounds = array<i64: 1>, scalar_prefetch = 0 : i64, scratch_operands = 0 : i64, tpu.core_type = #tpu.core_type<tc>, window_params = [{transform_indices = @transform_0, window_bounds = array<i64: 8, 32>}, {pipeline_mode = #tpu.pipeline_mode<synchronous>, transform_indices = @transform_1, window_bounds = array<i64: 32, 640>}, {pipeline_mode = #tpu.pipeline_mode<synchronous>, transform_indices = @transform_2, window_bounds = array<i64: 1, 640>}, {pipeline_mode = #tpu.pipeline_mode<synchronous>, transform_indices = @transform_3, window_bounds = array<i64: 640, 256>}, {pipeline_mode = #tpu.pipeline_mode<synchronous>, transform_indices = @transform_4, window_bounds = array<i64: 1, 256>}, {pipeline_mode = #tpu.pipeline_mode<synchronous>, transform_indices = @transform_5, window_bounds = array<i64: 1, 256>}, {pipeline_mode = #tpu.pipeline_mode<synchronous>, transform_indices = @transform_6, window_bounds = array<i64: 1, 1>}, {transform_indices = @transform_7, window_bounds = array<i64: 8, 1>}]} {
    %c0 = arith.constant 0 : index
    %c0_0 = arith.constant 0 : index
    %0 = vector.load %arg1[%c0, %c0_0] : memref<8x32xbf16, #tpu.memory_space<vmem>>, vector<8x32xbf16>
    %c0_1 = arith.constant 0 : index
    %c0_2 = arith.constant 0 : index
    %1 = vector.load %arg2[%c0_1, %c0_2] : memref<32x640xbf16, #tpu.memory_space<vmem>>, vector<32x640xbf16>
    %cst = arith.constant dense<0.000000e+00> : vector<8x640xf32>
    %2 = tpu.matmul %0, %1, %cst {dimension_numbers = #tpu.dot_dimension_numbers<[1], [0], [0], [1], [0, 0, 1, 1], [], []>} : vector<8x32xbf16>, vector<32x640xbf16>, vector<8x640xf32> -> vector<8x640xf32>
    %c0_3 = arith.constant 0 : index
    %c0_4 = arith.constant 0 : index
    %3 = vector.load %arg3[%c0_3, %c0_4] : memref<1x640xf32, #tpu.memory_space<vmem>>, vector<1x640xf32>
    %4 = vector.broadcast %3 : vector<1x640xf32> to vector<8x640xf32>
    %5 = arith.addf %2, %4 : vector<8x640xf32>
    %cst_5 = arith.constant 0.000000e+00 : f32
    %6 = vector.broadcast %cst_5 : f32 to vector<8x640xf32>
    %7 = arith.maximumf %5, %6 : vector<8x640xf32>
    %8 = arith.truncf %7 : vector<8x640xf32> to vector<8x640xbf16>
    %c0_6 = arith.constant 0 : index
    %c0_7 = arith.constant 0 : index
    %9 = vector.load %arg4[%c0_6, %c0_7] : memref<640x256xbf16, #tpu.memory_space<vmem>>, vector<640x256xbf16>
    %cst_8 = arith.constant dense<0.000000e+00> : vector<8x256xf32>
    %10 = tpu.matmul %8, %9, %cst_8 {dimension_numbers = #tpu.dot_dimension_numbers<[1], [0], [0], [1], [0, 0, 1, 1], [], []>} : vector<8x640xbf16>, vector<640x256xbf16>, vector<8x256xf32> -> vector<8x256xf32>
    %c0_9 = arith.constant 0 : index
    %c0_10 = arith.constant 0 : index
    %11 = vector.load %arg5[%c0_9, %c0_10] : memref<1x256xf32, #tpu.memory_space<vmem>>, vector<1x256xf32>
    %12 = vector.broadcast %11 : vector<1x256xf32> to vector<8x256xf32>
    %13 = arith.addf %10, %12 : vector<8x256xf32>
    %cst_11 = arith.constant 0.000000e+00 : f32
    %14 = vector.broadcast %cst_11 : f32 to vector<8x256xf32>
    %15 = arith.maximumf %13, %14 : vector<8x256xf32>
    %c0_12 = arith.constant 0 : index
    %c0_13 = arith.constant 0 : index
    %16 = vector.load %arg6[%c0_12, %c0_13] : memref<1x256xf32, #tpu.memory_space<vmem>>, vector<1x256xf32>
    %17 = vector.broadcast %16 : vector<1x256xf32> to vector<8x256xf32>
    %18 = arith.mulf %15, %17 : vector<8x256xf32>
    %cst_14 = arith.constant dense<0.000000e+00> : vector<8xf32>
    %19 = vector.multi_reduction <add>, %18, %cst_14 [1] : vector<8x256xf32> to vector<8xf32>
    %20 = vector.shape_cast %19 : vector<8xf32> to vector<8x1xf32>
    %c0_15 = arith.constant 0 : index
    %c0_16 = arith.constant 0 : index
    %21 = vector.load %arg7[%c0_15, %c0_16] : memref<1x1xf32, #tpu.memory_space<vmem>>, vector<1x1xf32>
    %22 = vector.broadcast %21 : vector<1x1xf32> to vector<8x1xf32>
    %23 = arith.addf %20, %22 : vector<8x1xf32>
    %cst_17 = arith.constant 0.000000e+00 : f32
    %24 = vector.broadcast %cst_17 : f32 to vector<8x1xf32>
    %25 = arith.subf %24, %23 : vector<8x1xf32>
    %26 = math.exp %25 : vector<8x1xf32>
    %cst_18 = arith.constant 1.000000e+00 : f32
    %27 = vector.broadcast %cst_18 : f32 to vector<8x1xf32>
    %28 = arith.addf %27, %26 : vector<8x1xf32>
    %cst_19 = arith.constant 1.000000e+00 : f32
    %29 = vector.broadcast %cst_19 : f32 to vector<8x1xf32>
    %30 = arith.divf %29, %28 : vector<8x1xf32>
    %c0_20 = arith.constant 0 : index
    %c0_21 = arith.constant 0 : index
    %31 = vector.load %arg8[%c0_20, %c0_21] : memref<8x1xf32, #tpu.memory_space<vmem>>, vector<8x1xf32>
    tpu.vector_store %arg8[%c0_20, %c0_21], %30 {strides = array<i32>} : memref<8x1xf32, #tpu.memory_space<vmem>>, vector<8x1xf32>,
    return
  }
  func.func @transform_0(%arg0: i32) -> (i32, i32) {
    %c0_i32 = arith.constant 0 : i32
    %c0_i32_0 = arith.constant 0 : i32
    return %arg0, %c0_i32 : i32, i32
  }
  func.func @transform_1(%arg0: i32) -> (i32, i32) {
    %c0_i32 = arith.constant 0 : i32
    %c0_i32_0 = arith.constant 0 : i32
    %c0_i32_1 = arith.constant 0 : i32
    return %c0_i32, %c0_i32_0 : i32, i32
  }
  func.func @transform_2(%arg0: i32) -> (i32, i32) {
    %c0_i32 = arith.constant 0 : i32
    %c0_i32_0 = arith.constant 0 : i32
    %c0_i32_1 = arith.constant 0 : i32
    return %c0_i32, %c0_i32_0 : i32, i32
  }
  func.func @transform_3(%arg0: i32) -> (i32, i32) {
    %c0_i32 = arith.constant 0 : i32
    %c0_i32_0 = arith.constant 0 : i32
    %c0_i32_1 = arith.constant 0 : i32
    return %c0_i32, %c0_i32_0 : i32, i32
  }
  func.func @transform_4(%arg0: i32) -> (i32, i32) {
    %c0_i32 = arith.constant 0 : i32
    %c0_i32_0 = arith.constant 0 : i32
    %c0_i32_1 = arith.constant 0 : i32
    return %c0_i32, %c0_i32_0 : i32, i32
  }
  func.func @transform_5(%arg0: i32) -> (i32, i32) {
    %c0_i32 = arith.constant 0 : i32
    %c0_i32_0 = arith.constant 0 : i32
    %c0_i32_1 = arith.constant 0 : i32
    return %c0_i32, %c0_i32_0 : i32, i32
  }
  func.func @transform_6(%arg0: i32) -> (i32, i32) {
    %c0_i32 = arith.constant 0 : i32
    %c0_i32_0 = arith.constant 0 : i32
    %c0_i32_1 = arith.constant 0 : i32
    return %c0_i32, %c0_i32_0 : i32, i32
  }
  func.func @transform_7(%arg0: i32) -> (i32, i32) {
    %c0_i32 = arith.constant 0 : i32
    %c0_i32_0 = arith.constant 0 : i32
    return %arg0, %c0_i32 : i32, i32
  }
}

</mosaic_0001>

<bundles_post_ra>
// kernel: tpu_custom_call.1
= control target key start
LH: loop header
LB: loop body
LE: loop exit
PB: predicated region body
PF: predicated region fallthrough
CT: control target
= control target key end

     0   :  { %s1575_s0 = inlined_call_operand.hbm [shape: bf16[8,32], index: 0, kind: input, shape index: {}]   ;;  %s1576_s1 = inlined_call_operand.hbm [shape: bf16[32,640], index: 1, kind: input, shape index: {}]   ;;  %s1577_s2 = inlined_call_operand.hbm [shape: f32[1,640], index: 2, kind: input, shape index: {}]   ;;  %s1578_s3 = inlined_call_operand.hbm [shape: bf16[640,256], index: 3, kind: input, shape index: {}]   ;;  %s1579_s4 = inlined_call_operand.vmem [shape: f32[1,256], index: 4, kind: input, shape index: {}]   ;;  %s1580_s5 = inlined_call_operand.vmem [shape: f32[1,256], index: 5, kind: input, shape index: {}]   ;;  %s1581_s6 = inlined_call_operand.<no memory space> [shape: f32[1,1], index: 6, kind: input, shape index: {}]   ;;  %s1582_s7 = inlined_call_operand.vmem [shape: f32[8,1], index: 7, kind: output, shape index: {}]  }
   0x1   :  { %v12_v0 = vstv %s1581_s6 }
   0x2   :  { %13 = vst [vmem:[#allocation2] sm:$0x1] %v12_v0 }
   0x3   :  { %14 = vsyncpa [#allocation4], 0 }
   0x4   :  { %15 = vsyncpa [#allocation6], 0  ;;  %s32_s28 = sshll.u32 %s1576_s1, 4  ;;  %s33_s28 = int_to_ptr.hbm [resolvable:$true] %s32_s28 }
   0x5   :  { %16 = vsyncpa [#allocation9], 0  ;;  %s1476_s29 = smov [#allocation5]   ;;  %s22_s10 = sshll.u32 %s1575_s0, 4  ;;  %s23_s10 = int_to_ptr.hbm [resolvable:$true] %s22_s10 }
   0x6   :  { %s34_s30 = sshll.u32 %s1476_s29, 4  ;;  %s1477_s11 = smov 320   ;;  %s35_s30 = int_to_ptr.vmem [resolvable:$true] %s34_s30 }
   0x7   :  { %s1478_s12 = smov 20   ;;  %s1479_s6 = smov [#allocation3]  }
   0x8   :  { %40 = dma.hbm_to_vmem [thread:$0]  %s33_s28, 1280, %s35_s30, [#allocation6], %s1477_s11, %s1477_s11, %s1478_s12  }
   0x9   :  { %s24_s13 = sshll.u32 %s1479_s6, 4  ;;  %s46_s16 = sshll.u32 %s1577_s2, 4  ;;  %s25_s13 = int_to_ptr.vmem [resolvable:$true] %s24_s13  ;;  %s47_s16 = int_to_ptr.hbm [resolvable:$true] %s46_s16 }
   0xa   :  { %27 = dma.hbm_to_vmem [thread:$0]  %s23_s10, 64, %s25_s13, [#allocation4]  }
   0xb   :  { %s56_s18 = sshll.u32 %s1578_s3, 4  ;;  %s1480_s19 = smov [#allocation7]   ;;  %s57_s18 = int_to_ptr.hbm [resolvable:$true] %s56_s18 }
   0xc   :  { %s48_s20 = sshll.u32 %s1480_s19, 4  ;;  %s1481_s0 = smov [#allocation8]   ;;  %s49_s20 = int_to_ptr.vmem [resolvable:$true] %s48_s20 }
   0xd   :  { %51 = dma.hbm_to_vmem [thread:$0]  %s47_s16, 80, %s49_s20, [#allocation6]  }
   0xe   :  { %s58_s21 = sshll.u32 %s1481_s0, 4  ;;  %s1482_s22 = smov 128   ;;  %s59_s21 = int_to_ptr.vmem [resolvable:$true] %s58_s21 }
   0xf   :  { %s1483_s23 = smov 8  }
  0x10   :  { %64 = dma.hbm_to_vmem [thread:$0]  %s57_s18, 10240, %s59_s21, [#allocation9], %s1482_s22, %s1482_s22, %s1483_s23  }
  0x11   :  { %1470 = dma.done.wait [#allocation4], 64  }
  0x12   :  { %1471 = vsyncadd [#allocation4], 4294967232 }
  0x13   :  { %1472 = dma.done.wait [#allocation6], 1360  }
  0x14   :  { %1473 = vsyncadd [#allocation6], 4294965936 }
  0x15   :  { %1474 = dma.done.wait [#allocation9], 10240  }
  0x16   :  { %1475 = vsyncadd [#allocation9], 4294957056  ;;  %v928_v1 = vld [vmem:[#allocation5 + $0x28] sm:$0xf]  ;;  %v1278_v2 = vld [vmem:[#allocation5 + $0x38] sm:$0xf0] }
  0x17   :  { %v1276_v3 = vld [vmem:[#allocation5 + $0x2c] sm:$0xf]  ;;  %v929_v4 = vor.u32 %v1278_v2, %v928_v1  ;;  %v930_v5 = vld [vmem:[#allocation5 + $0x3c] sm:$0xf0]  ;;  %v936_v6 = vld [vmem:[#allocation5 + $0x30] sm:$0xf] }
  0x18   :  { %v1279_v7 = vld [vmem:[#allocation5 + $0x40] sm:$0xf0]  ;;  %v933_v8 = vor.u32 %v1276_v3, %v930_v5  ;;  %v908_v10 = vld [vmem:[#allocation5] sm:$0xf]  ;;  %v1273_v11 = vld [vmem:[#allocation5 + $0x10] sm:$0xf0] }
  0x19   :  { %v937_v9 = vor.u32 %v1279_v7, %v936_v6  ;;  %v1271_v12 = vld [vmem:[#allocation5 + $0x4] sm:$0xf]  ;;  %175 = vmatpush.bf16.msra.mxu0 %v929_v4  ;;  %v909_v13 = vor.u32 %v1273_v11, %v908_v10  ;;  %v910_v14 = vld [vmem:[#allocation5 + $0x14] sm:$0xf0]  ;;  %v916_v15 = vld [vmem:[#allocation5 + $0x8] sm:$0xf] }
  0x1a   :  { %v1274_v16 = vld [vmem:[#allocation5 + $0x18] sm:$0xf0]  ;;  %188 = vmatpush.bf16.msra.mxu3 %v933_v8  ;;  %v913_v17 = vor.u32 %v1271_v12, %v910_v14  ;;  %vm165_vm0 = vcmask 261120   ;;  %v1277_v19 = vld [vmem:[#allocation5 + $0x34] sm:$0xf]  ;;  %vm897_vm4 = vcmask 7168  }
  0x1b   :  { %201 = vmatpush.bf16.msra.mxu2 %v937_v9  ;;  %v917_v18 = vor.u32 %v1274_v16, %v916_v15  ;;  %v938_v20 = vld [vmem:[#allocation5 + $0x44] sm:$0xf0]  ;;  %v1539_v21 = vld [vmem:[#allocation3] sm:$0xf]  ;;  %v944_v23 = vld [vmem:[#allocation5 + $0x38] sm:$0xf] }
  0x1c   :  { %v941_v22 = vor.u32 %v1277_v19, %v938_v20  ;;  %v1280_v24 = vld [vmem:[#allocation5 + $0x48] sm:$0xf0]  ;;  %v918_v27 = vld [vmem:[#allocation5 + $0x1c] sm:$0xf0]  ;;  %v924_v28 = vld [vmem:[#allocation5 + $0x10] sm:$0xf] }
  0x1d   :  { %v1272_v25 = vld [vmem:[#allocation5 + $0xc] sm:$0xf]  ;;  %v945_v26 = vor.u32 %v1280_v24, %v944_v23  ;;  %v1275_v29 = vld [vmem:[#allocation5 + $0x20] sm:$0xf0]  ;;  %176 = vmatpush.bf16.msra.mxu0 %v909_v13  ;;  %v1001_v32 = vld [vmem:[#allocation8 + $0x60] sm:$0xf] }
  0x1e   :  { %v1009_v30 = vld [vmem:[#allocation8 + $0x70] sm:$0xf]  ;;  %v1296_v31 = vld [vmem:[#allocation8 + $0x74] sm:$0xf0]  ;;  %189 = vmatpush.bf16.msra.mxu3 %v913_v17  ;;  %v1294_v34 = vld [vmem:[#allocation8 + $0x64] sm:$0xf0]  ;;  %v921_v37 = vor.u32 %v1272_v25, %v918_v27  ;;  %v925_v38 = vor.u32 %v1275_v29, %v924_v28 }
  0x1f   :  { %202 = vmatpush.bf16.msra.mxu2 %v917_v18  ;;  %v1010_v33 = vor.u32 %v1296_v31, %v1009_v30  ;;  %v1073_v35 = vld [vmem:[#allocation8 + $0xf0] sm:$0xf]  ;;  %v1312_v36 = vld [vmem:[#allocation8 + $0xf4] sm:$0xf0]  ;;  %v1065_v40 = vld [vmem:[#allocation8 + $0xe0] sm:$0xf]  ;;  %v1002_v41 = vor.u32 %v1294_v34, %v1001_v32 }
  0x20   :  { %v1074_v39 = vor.u32 %v1312_v36, %v1073_v35  ;;  %946 = vmatmul.msk.bf16.vlgmr.msra.gmra.mxu0 %vm165_vm0, %v1539_v21  ;;  %v1310_v42 = vld [vmem:[#allocation8 + $0xe4] sm:$0xf0]  ;;  %v993_v43 = vld [vmem:[#allocation8 + $0x50] sm:$0xf]  ;;  %v1292_v44 = vld [vmem:[#allocation8 + $0x54] sm:$0xf0] }
  0x21   :  { %227 = vmatpush.bf16.msrb.mxu0 %v945_v26  ;;  %730 = vmatpush.bf16.msra.mxu1 %v1010_v33  ;;  %v1066_v45 = vor.u32 %v1310_v42, %v1065_v40  ;;  %v1057_v46 = vld [vmem:[#allocation8 + $0xd0] sm:$0xf]  ;;  %v1308_v47 = vld [vmem:[#allocation8 + $0xd4] sm:$0xf0]  ;;  %v994_v50 = vor.u32 %v1292_v44, %v993_v43  ;;  %v985_v51 = vld [vmem:[#allocation8 + $0x40] sm:$0xf] }
  0x22   :  { %214 = vmatpush.bf16.msrb.mxu3 %v941_v22  ;;  %948 = vmatmul.msk.bf16.vlgmr.msra.gmra.mxu2 %vm165_vm0, %v1539_v21  ;;  %v1137_v48 = vld [vmem:[#allocation8 + $0x170] sm:$0xf]  ;;  %v1328_v49 = vld [vmem:[#allocation8 + $0x174] sm:$0xf0]  ;;  %v1290_v53 = vld [vmem:[#allocation8 + $0x44] sm:$0xf0]  ;;  %v1058_v56 = vor.u32 %v1308_v47, %v1057_v46 }
  0x23   :  { %947 = vmatmul.msk.bf16.vlgmr.msra.gmra.mxu3 %vm165_vm0, %v1539_v21  ;;  %743 = vmatpush.bf16.msrb.mxu2 %v1074_v39  ;;  %v1138_v52 = vor.u32 %v1328_v49, %v1137_v48  ;;  %v1129_v54 = vld [vmem:[#allocation8 + $0x160] sm:$0xf]  ;;  %v1326_v55 = vld [vmem:[#allocation8 + $0x164] sm:$0xf0]  ;;  %v1121_v60 = vld [vmem:[#allocation8 + $0x150] sm:$0xf]  ;;  %v986_v62 = vor.u32 %v1290_v53, %v985_v51 }
  0x24   :  { %v1049_v57 = vld [vmem:[#allocation8 + $0xc0] sm:$0xf]  ;;  %v1130_v58 = vor.u32 %v1326_v55, %v1129_v54  ;;  %v1306_v59 = vld [vmem:[#allocation8 + $0xc4] sm:$0xf0]  ;;  %v1324_v61 = vld [vmem:[#allocation8 + $0x154] sm:$0xf0] }
  0x25   :  { %228 = vmatpush.bf16.msrb.mxu0 %v925_v38  ;;  %731 = vmatpush.bf16.msra.mxu1 %v1002_v41  ;;  %v977_v63 = vld [vmem:[#allocation8 + $0x30] sm:$0xf]  ;;  %v1288_v0 = vld [vmem:[#allocation8 + $0x34] sm:$0xf0]  ;;  %v1050_v1 = vor.u32 %v1306_v59, %v1049_v57  ;;  %v1122_v3 = vor.u32 %v1324_v61, %v1121_v60  ;;  %v1113_v5 = vld [vmem:[#allocation8 + $0x140] sm:$0xf] }
  0x26   :  { %215 = vmatpush.bf16.msrb.mxu3 %v921_v37  ;;  %v1041_v2 = vld [vmem:[#allocation8 + $0xb0] sm:$0xf]  ;;  %v1304_v4 = vld [vmem:[#allocation8 + $0xb4] sm:$0xf0]  ;;  %v1322_v6 = vld [vmem:[#allocation8 + $0x144] sm:$0xf0]  ;;  %v978_v7 = vor.u32 %v1288_v0, %v977_v63 }
  0x27   :  { %744 = vmatpush.bf16.msrb.mxu2 %v1066_v45  ;;  %v1201_v8 = vld [vmem:[#allocation8 + $0x1f0] sm:$0xf]  ;;  %v1344_v9 = vld [vmem:[#allocation8 + $0x1f4] sm:$0xf0]  ;;  %v969_v10 = vld [vmem:[#allocation8 + $0x20] sm:$0xf]  ;;  %v1042_v13 = vor.u32 %v1304_v4, %v1041_v2  ;;  %v1114_v16 = vor.u32 %v1322_v6, %v1113_v5 }
  0x28   :  { %v1286_v11 = vld [vmem:[#allocation8 + $0x24] sm:$0xf0]  ;;  %v1202_v12 = vor.u32 %v1344_v9, %v1201_v8  ;;  %v1033_v14 = vld [vmem:[#allocation8 + $0xa0] sm:$0xf]  ;;  %v1105_v17 = vld [vmem:[#allocation8 + $0x130] sm:$0xf] }
  0x29   :  { %732 = vmatpush.bf16.msra.mxu1 %v994_v50  ;;  %v1302_v15 = vld [vmem:[#allocation8 + $0xa4] sm:$0xf0]  ;;  %v1320_v18 = vld [vmem:[#allocation8 + $0x134] sm:$0xf0]  ;;  %v1193_v19 = vld [vmem:[#allocation8 + $0x1e0] sm:$0xf]  ;;  %v970_v22 = vor.u32 %v1286_v11, %v969_v10 }
  0x2a   :  { %756 = vmatpush.bf16.msra.mxu3 %v1138_v52  ;;  %769 = vmatpush.bf16.msra.mxu0 %v1202_v12  ;;  %v1342_v20 = vld [vmem:[#allocation8 + $0x1e4] sm:$0xf0]  ;;  %v961_v24 = vld [vmem:[#allocation8 + $0x10] sm:$0xf]  ;;  %v1284_v25 = vld [vmem:[#allocation8 + $0x14] sm:$0xf0]  ;;  %v1034_v27 = vor.u32 %v1302_v15, %v1033_v14  ;;  %v1106_v29 = vor.u32 %v1320_v18, %v1105_v17 }
  0x2b   :  { %745 = vmatpush.bf16.msrb.mxu2 %v1058_v56  ;;  %v1194_v23 = vor.u32 %v1342_v20, %v1193_v19  ;;  %v1185_v26 = vld [vmem:[#allocation8 + $0x1d0] sm:$0xf]  ;;  %v1340_v30 = vld [vmem:[#allocation8 + $0x1d4] sm:$0xf0]  ;;  %v1097_v32 = vld [vmem:[#allocation8 + $0x120] sm:$0xf]  ;;  %v962_v35 = vor.u32 %v1284_v25, %v961_v24 }
  0x2c   :  { %v1025_v28 = vld [vmem:[#allocation8 + $0x90] sm:$0xf]  ;;  %v1300_v31 = vld [vmem:[#allocation8 + $0x94] sm:$0xf0]  ;;  %v1318_v33 = vld [vmem:[#allocation8 + $0x124] sm:$0xf0]  ;;  %v1186_v34 = vor.u32 %v1340_v30, %v1185_v26 }
  0x2d   :  { %733 = vmatpush.bf16.msra.mxu1 %v986_v62  ;;  %v1177_v36 = vld [vmem:[#allocation8 + $0x1c0] sm:$0xf]  ;;  %v1338_v37 = vld [vmem:[#allocation8 + $0x1c4] sm:$0xf0]  ;;  %v1265_v39 = vld [vmem:[#allocation8 + $0x270] sm:$0xf]  ;;  %v1026_v41 = vor.u32 %v1300_v31, %v1025_v28  ;;  %v1098_v44 = vor.u32 %v1318_v33, %v1097_v32 }
  0x2e   :  { %757 = vmatpush.bf16.msra.mxu3 %v1130_v58  ;;  %770 = vmatpush.bf16.msra.mxu0 %v1194_v23  ;;  %v953_v38 = vld [vmem:[#allocation8] sm:$0xf]  ;;  %v1360_v40 = vld [vmem:[#allocation8 + $0x274] sm:$0xf0]  ;;  %v1298_v43 = vld [vmem:[#allocation8 + $0x84] sm:$0xf0]  ;;  %v1178_v47 = vor.u32 %v1338_v37, %v1177_v36 }
  0x2f   :  { %746 = vmatpush.bf16.msrb.mxu2 %v1050_v1  ;;  %v1017_v42 = vld [vmem:[#allocation8 + $0x80] sm:$0xf]  ;;  %v1089_v45 = vld [vmem:[#allocation8 + $0x110] sm:$0xf]  ;;  %v1316_v46 = vld [vmem:[#allocation8 + $0x114] sm:$0xf0]  ;;  %v1266_v51 = vor.u32 %v1360_v40, %v1265_v39 }
  0x30   :  { %950 = vmatmul.msk.bf16.vlgmr.msrb.gmra.mxu0 %vm165_vm0, %v1539_v21  ;;  %v1295_v49 = vld [vmem:[#allocation8 + $0x74] sm:$0xf]  ;;  %v1011_v50 = vld [vmem:[#allocation8 + $0x78] sm:$0xf0]  ;;  %v1257_v52 = vld [vmem:[#allocation8 + $0x260] sm:$0xf]  ;;  %v1018_v54 = vor.u32 %v1298_v43, %v1017_v42  ;;  %v1090_v55 = vor.u32 %v1316_v46, %v1089_v45 }
  0x31   :  { %734 = vmatpush.bf16.msra.mxu1 %v978_v7  ;;  %v1358_v53 = vld [vmem:[#allocation8 + $0x264] sm:$0xf0]  ;;  %v1014_v56 = vor.u32 %v1295_v49, %v1011_v50  ;;  %v1293_v57 = vld [vmem:[#allocation8 + $0x64] sm:$0xf]  ;;  %v1081_v58 = vld [vmem:[#allocation8 + $0x100] sm:$0xf] }
  0x32   :  { %758 = vmatpush.bf16.msra.mxu3 %v1122_v3  ;;  %771 = vmatpush.bf16.msra.mxu0 %v1186_v34  ;;  %v1314_v59 = vld [vmem:[#allocation8 + $0x104] sm:$0xf0]  ;;  %v1003_v60 = vld [vmem:[#allocation8 + $0x68] sm:$0xf0]  ;;  %v1311_v61 = vld [vmem:[#allocation8 + $0xf4] sm:$0xf]  ;;  %v1258_v63 = vor.u32 %v1358_v53, %v1257_v52 }
  0x33   :  { %949 = vmatmul.msk.bf16.vlgmr.msrb.gmra.mxu3 %vm165_vm0, %v1539_v21  ;;  %747 = vmatpush.bf16.msrb.mxu2 %v1042_v13  ;;  %v1282_v21 = vld [vmem:[#allocation8 + $0x4] sm:$0xf0]  ;;  %v1075_v62 = vld [vmem:[#allocation8 + $0xf8] sm:$0xf0]  ;;  %v1249_v0 = vld [vmem:[#allocation8 + $0x250] sm:$0xf]  ;;  %v1082_v2 = vor.u32 %v1314_v59, %v1081_v58  ;;  %v1006_v3 = vor.u32 %v1293_v57, %v1003_v60 }
  0x34   :  { %v954_v48 = vor.u32 %v1282_v21, %v953_v38  ;;  %v1356_v1 = vld [vmem:[#allocation8 + $0x254] sm:$0xf0]  ;;  %v1078_v4 = vor.u32 %v1311_v61, %v1075_v62  ;;  %v1291_v5 = vld [vmem:[#allocation8 + $0x54] sm:$0xf]  ;;  %v995_v6 = vld [vmem:[#allocation8 + $0x58] sm:$0xf0] }
  0x35   :  { %735 = vmatpush.bf16.msra.mxu1 %v970_v22  ;;  %v1250_v7 = vor.u32 %v1356_v1, %v1249_v0  ;;  %v1241_v8 = vld [vmem:[#allocation8 + $0x240] sm:$0xf]  ;;  %v1354_v9 = vld [vmem:[#allocation8 + $0x244] sm:$0xf0]  ;;  %v998_v10 = vor.u32 %v1291_v5, %v995_v6  ;;  %v1289_v11 = vld [vmem:[#allocation8 + $0x44] sm:$0xf] }
  0x36   :  { %759 = vmatpush.bf16.msra.mxu3 %v1114_v16  ;;  %772 = vmatpush.bf16.msra.mxu0 %v1178_v47  ;;  %v987_v12 = vld [vmem:[#allocation8 + $0x48] sm:$0xf0]  ;;  %v1242_v13 = vor.u32 %v1354_v9, %v1241_v8  ;;  %v1233_v14 = vld [vmem:[#allocation8 + $0x230] sm:$0xf]  ;;  %v1352_v15 = vld [vmem:[#allocation8 + $0x234] sm:$0xf0] }
  0x37   :  { %748 = vmatpush.bf16.msrb.mxu2 %v1034_v27  ;;  %v990_v16 = vor.u32 %v1289_v11, %v987_v12  ;;  %v1234_v17 = vor.u32 %v1352_v15, %v1233_v14  ;;  %v1225_v18 = vld [vmem:[#allocation8 + $0x220] sm:$0xf]  ;;  %v1350_v19 = vld [vmem:[#allocation8 + $0x224] sm:$0xf0]  ;;  %v1169_v22 = vld [vmem:[#allocation8 + $0x1b0] sm:$0xf] }
  0x38   :  { %v1226_v20 = vor.u32 %v1350_v19, %v1225_v18  ;;  %v1336_v23 = vld [vmem:[#allocation8 + $0x1b4] sm:$0xf0]  ;;  %v1287_v24 = vld [vmem:[#allocation8 + $0x34] sm:$0xf]  ;;  %v979_v26 = vld [vmem:[#allocation8 + $0x38] sm:$0xf0] }
  0x39   :  { %736 = vmatpush.bf16.msra.mxu1 %v962_v35  ;;  %v1170_v25 = vor.u32 %v1336_v23, %v1169_v22  ;;  %v1309_v27 = vld [vmem:[#allocation8 + $0xe4] sm:$0xf]  ;;  %v1067_v28 = vld [vmem:[#allocation8 + $0xe8] sm:$0xf0]  ;;  %v1217_v31 = vld [vmem:[#allocation8 + $0x210] sm:$0xf] }
  0x3a   :  { %760 = vmatpush.bf16.msra.mxu3 %v1106_v29  ;;  %v982_v29 = vor.u32 %v1287_v24, %v979_v26  ;;  %v1070_v30 = vor.u32 %v1309_v27, %v1067_v28  ;;  %v1348_v32 = vld [vmem:[#allocation8 + $0x214] sm:$0xf0]  ;;  %v1161_v34 = vld [vmem:[#allocation8 + $0x1a0] sm:$0xf]  ;;  %v1334_v35 = vld [vmem:[#allocation8 + $0x1a4] sm:$0xf0] }
  0x3b   :  { %749 = vmatpush.bf16.msrb.mxu2 %v1026_v41  ;;  %773 = vmatpush.bf16.msra.mxu0 %v1170_v25  ;;  %v1218_v33 = vor.u32 %v1348_v32, %v1217_v31  ;;  %v1285_v36 = vld [vmem:[#allocation8 + $0x24] sm:$0xf]  ;;  %v1162_v37 = vor.u32 %v1334_v35, %v1161_v34  ;;  %v971_v38 = vld [vmem:[#allocation8 + $0x28] sm:$0xf0]  ;;  %v1307_v21 = vld [vmem:[#allocation8 + $0xd4] sm:$0xf] }
  0x3c   :  { %v974_v39 = vor.u32 %v1285_v36, %v971_v38  ;;  %v1059_v40 = vld [vmem:[#allocation8 + $0xd8] sm:$0xf0]  ;;  %v1209_v41 = vld [vmem:[#allocation8 + $0x200] sm:$0xf]  ;;  %v1346_v42 = vld [vmem:[#allocation8 + $0x204] sm:$0xf0] }
  0x3d   :  { %737 = vmatpush.bf16.msra.mxu1 %v954_v48  ;;  %v1062_v43 = vor.u32 %v1307_v21, %v1059_v40  ;;  %v1153_v45 = vld [vmem:[#allocation8 + $0x190] sm:$0xf]  ;;  %v1332_v46 = vld [vmem:[#allocation8 + $0x194] sm:$0xf0]  ;;  %v1283_v47 = vld [vmem:[#allocation8 + $0x14] sm:$0xf] }
  0x3e   :  { %761 = vmatpush.bf16.msra.mxu3 %v1098_v44  ;;  %v1210_v44 = vor.u32 %v1346_v42, %v1209_v41  ;;  %v1154_v48 = vor.u32 %v1332_v46, %v1153_v45  ;;  %v963_v49 = vld [vmem:[#allocation8 + $0x18] sm:$0xf0]  ;;  %v1305_v50 = vld [vmem:[#allocation8 + $0xc4] sm:$0xf]  ;;  %v955_v58 = vld [vmem:[#allocation8 + $0x8] sm:$0xf0] }
  0x3f   :  { %750 = vmatpush.bf16.msrb.mxu2 %v1018_v54  ;;  %774 = vmatpush.bf16.msra.mxu0 %v1162_v37  ;;  %v966_v52 = vor.u32 %v1283_v47, %v963_v49  ;;  %v1145_v54 = vld [vmem:[#allocation8 + $0x180] sm:$0xf]  ;;  %v1303_v59 = vld [vmem:[#allocation8 + $0xb4] sm:$0xf]  ;;  %v1043_v60 = vld [vmem:[#allocation8 + $0xb8] sm:$0xf0] }
  0x40   :  { %v1046_v62 = vor.u32 %v1303_v59, %v1043_v60  ;;  %v1139_v0 = vld [vmem:[#allocation8 + $0x178] sm:$0xf0]  ;;  %v1131_v6 = vld [vmem:[#allocation8 + $0x168] sm:$0xf0]  ;;  %v1299_v8 = vld [vmem:[#allocation8 + $0x94] sm:$0xf] }
  0x41   :  { %782 = vmatpush.bf16.msrb.mxu1 %v1266_v51  ;;  %v1051_v51 = vld [vmem:[#allocation8 + $0xc8] sm:$0xf0]  ;;  %v1027_v9 = vld [vmem:[#allocation8 + $0x98] sm:$0xf0]  ;;  %v1297_v14 = vld [vmem:[#allocation8 + $0x84] sm:$0xf] }
  0x42   :  { %762 = vmatpush.bf16.msra.mxu3 %v1090_v55  ;;  %v1054_v53 = vor.u32 %v1305_v50, %v1051_v51  ;;  %v1330_v55 = vld [vmem:[#allocation8 + $0x184] sm:$0xf0]  ;;  %v1030_v11 = vor.u32 %v1299_v8, %v1027_v9  ;;  %v1123_v12 = vld [vmem:[#allocation8 + $0x158] sm:$0xf0]  ;;  %v1019_v15 = vld [vmem:[#allocation8 + $0x88] sm:$0xf0] }
  0x43   :  { %795 = vmatpush.bf16.msra.mxu2 %v1014_v56  ;;  %775 = vmatpush.bf16.msra.mxu0 %v1154_v48  ;;  %v1281_v56 = vld [vmem:[#allocation8 + $0x4] sm:$0xf]  ;;  %v1146_v57 = vor.u32 %v1330_v55, %v1145_v54  ;;  %v1115_v18 = vld [vmem:[#allocation8 + $0x148] sm:$0xf0]  ;;  %v1551_v19 = vld [vmem:[#allocation7] sm:$0x1f] }
  0x44   :  { %v958_v61 = vor.u32 %v1281_v56, %v955_v58  ;;  %v103_v22 = vperm.slane %v1551_v19, 0  ;;  %v1319_v23 = vld [vmem:[#allocation8 + $0x134] sm:$0xf]  ;;  %v1107_v24 = vld [vmem:[#allocation8 + $0x138] sm:$0xf0]  ;;  %v104_v34 = vperm.slane %v1551_v19, 1 }
  0x45   :  { %783 = vmatpush.bf16.msrb.mxu1 %v1258_v63  ;;  %v1327_v63 = vld [vmem:[#allocation8 + $0x174] sm:$0xf]  ;;  %v1110_v25 = vor.u32 %v1319_v23, %v1107_v24  ;;  %v1317_v27 = vld [vmem:[#allocation8 + $0x124] sm:$0xf]  ;;  %v1099_v28 = vld [vmem:[#allocation8 + $0x128] sm:$0xf0] }
  0x46   :  { %763 = vmatpush.bf16.msra.mxu3 %v1082_v2  ;;  %v1142_v1 = vor.u32 %v1327_v63, %v1139_v0  ;;  %v1301_v2 = vld [vmem:[#allocation8 + $0xa4] sm:$0xf]  ;;  %v1203_v31 = vld [vmem:[#allocation8 + $0x1f8] sm:$0xf0]  ;;  %v1102_v32 = vor.u32 %v1317_v27, %v1099_v28  ;;  %v105_v35 = vperm.slane %v1551_v19, 2  ;;  %v107_v63 = vperm.slane %v1551_v19, 4 }
  0x47   :  { %796 = vmatpush.bf16.msra.mxu2 %v1006_v3  ;;  %776 = vmatpush.bf16.msra.mxu0 %v1146_v57  ;;  %v1035_v3 = vld [vmem:[#allocation8 + $0xa8] sm:$0xf0]  ;;  %v1341_v36 = vld [vmem:[#allocation8 + $0x1e4] sm:$0xf]  ;;  %v1315_v21 = vld [vmem:[#allocation8 + $0x114] sm:$0xf] }
  0x48   :  { %v1038_v5 = vor.u32 %v1301_v2, %v1035_v3  ;;  %v1195_v38 = vld [vmem:[#allocation8 + $0x1e8] sm:$0xf0]  ;;  %v1313_v45 = vld [vmem:[#allocation8 + $0x104] sm:$0xf]  ;;  %v1359_v50 = vld [vmem:[#allocation8 + $0x274] sm:$0xf] }
  0x49   :  { %784 = vmatpush.bf16.msrb.mxu1 %v1250_v7  ;;  %v1083_v46 = vld [vmem:[#allocation8 + $0x108] sm:$0xf0]  ;;  %v1267_v51 = vld [vmem:[#allocation8 + $0x278] sm:$0xf0]  ;;  %v1337_v0 = vld [vmem:[#allocation8 + $0x1c4] sm:$0xf] }
  0x4a   :  { %808 = vmatpush.bf16.msrb.mxu3 %v1078_v4  ;;  %v1325_v4 = vld [vmem:[#allocation8 + $0x164] sm:$0xf]  ;;  %v1187_v54 = vld [vmem:[#allocation8 + $0x1d8] sm:$0xf0]  ;;  %v1270_v57 = vor.u32 %v1359_v50, %v1267_v51  ;;  %v1351_v28 = vld [vmem:[#allocation8 + $0x234] sm:$0xf] }
  0x4b   :  { %797 = vmatpush.bf16.msra.mxu2 %v998_v10  ;;  %821 = vmatpush.bf16.msrb.mxu0 %v1142_v1  ;;  %v1134_v7 = vor.u32 %v1325_v4, %v1131_v6  ;;  %v1323_v10 = vld [vmem:[#allocation8 + $0x154] sm:$0xf]  ;;  %v1179_v1 = vld [vmem:[#allocation8 + $0x1c8] sm:$0xf0]  ;;  %v1251_v8 = vld [vmem:[#allocation8 + $0x258] sm:$0xf0] }
  0x4c   :  { %v1182_v6 = vor.u32 %v1337_v0, %v1179_v1 }
  0x4d   :  { %785 = vmatpush.bf16.msrb.mxu1 %v1242_v13  ;;  %v1126_v13 = vor.u32 %v1323_v10, %v1123_v12  ;;  %v1335_v10 = vld [vmem:[#allocation8 + $0x1b4] sm:$0xf] }
  0x4e   :  { %809 = vmatpush.bf16.msrb.mxu3 %v1070_v30  ;;  %v1343_v30 = vld [vmem:[#allocation8 + $0x1f4] sm:$0xf] }
  0x4f   :  { %798 = vmatpush.bf16.msra.mxu2 %v990_v16  ;;  %822 = vmatpush.bf16.msrb.mxu0 %v1134_v7  ;;  %v1321_v16 = vld [vmem:[#allocation8 + $0x144] sm:$0xf]  ;;  %v1206_v37 = vor.u32 %v1343_v30, %v1203_v31  ;;  %v1355_v7 = vld [vmem:[#allocation8 + $0x254] sm:$0xf]  ;;  %v1155_v31 = vld [vmem:[#allocation8 + $0x198] sm:$0xf0] }
  0x50   :  { %v1331_v30 = vld [vmem:[#allocation8 + $0x194] sm:$0xf] }
  0x51   :  { %786 = vmatpush.bf16.msrb.mxu1 %v1234_v17  ;;  %v1022_v17 = vor.u32 %v1297_v14, %v1019_v15  ;;  %v106_v14 = vperm.slane %v1551_v19, 3 }
  0x52   :  { %810 = vmatpush.bf16.msrb.mxu3 %v1062_v43 }
  0x53   :  { %799 = vmatpush.bf16.msra.mxu2 %v982_v29  ;;  %823 = vmatpush.bf16.msrb.mxu0 %v1126_v13  ;;  %v1254_v13 = vor.u32 %v1355_v7, %v1251_v8 }
  0x55   :  { %787 = vmatpush.bf16.msrb.mxu1 %v1226_v20  ;;  %v1118_v20 = vor.u32 %v1321_v16, %v1115_v18  ;;  %v1353_v16 = vld [vmem:[#allocation8 + $0x244] sm:$0xf] }
  0x56   :  { %811 = vmatpush.bf16.msrb.mxu3 %v1054_v53  ;;  %v1339_v53 = vld [vmem:[#allocation8 + $0x1d4] sm:$0xf] }
  0x57   :  { %800 = vmatpush.bf16.msra.mxu2 %v974_v39  ;;  %824 = vmatpush.bf16.msrb.mxu0 %v1118_v20  ;;  %v1091_v39 = vld [vmem:[#allocation8 + $0x118] sm:$0xf0]  ;;  %v1190_v60 = vor.u32 %v1339_v53, %v1187_v54  ;;  %v1333_v20 = vld [vmem:[#allocation8 + $0x1a4] sm:$0xf] }
  0x58   :  { %v1094_v41 = vor.u32 %v1315_v21, %v1091_v39 }
  0x59   :  { %788 = vmatpush.bf16.msrb.mxu1 %v1218_v33 }
  0x5a   :  { %812 = vmatpush.bf16.msrb.mxu3 %v1046_v62  ;;  %v1259_v62 = vld [vmem:[#allocation8 + $0x268] sm:$0xf0] }
  0x5b   :  { %801 = vmatpush.bf16.msra.mxu2 %v966_v52  ;;  %825 = vmatpush.bf16.msrb.mxu0 %v1110_v25  ;;  %v1086_v52 = vor.u32 %v1313_v45, %v1083_v46  ;;  %v1345_v45 = vld [vmem:[#allocation8 + $0x204] sm:$0xf]  ;;  %v1211_v46 = vld [vmem:[#allocation8 + $0x208] sm:$0xf0] }
  0x5d   :  { %789 = vmatpush.bf16.msrb.mxu1 %v1210_v44  ;;  %v1198_v44 = vor.u32 %v1341_v36, %v1195_v38  ;;  %v1227_v36 = vld [vmem:[#allocation8 + $0x228] sm:$0xf0] }
  0x5e   :  { %813 = vmatpush.bf16.msrb.mxu3 %v1038_v5  ;;  %v1147_v38 = vld [vmem:[#allocation8 + $0x188] sm:$0xf0] }
  0x5f   :  { %802 = vmatpush.bf16.msra.mxu2 %v958_v61  ;;  %826 = vmatpush.bf16.msrb.mxu0 %v1102_v32  ;;  %v1357_v61 = vld [vmem:[#allocation8 + $0x264] sm:$0xf] }
  0x60   :  { %v1262_v4 = vor.u32 %v1357_v61, %v1259_v62 }
  0x62   :  { %814 = vmatpush.bf16.msrb.mxu3 %v1030_v11  ;;  %v1171_v11 = vld [vmem:[#allocation8 + $0x1b8] sm:$0xf0] }
  0x63   :  { %827 = vmatpush.bf16.msrb.mxu0 %v1094_v41  ;;  %v1174_v15 = vor.u32 %v1335_v10, %v1171_v11  ;;  %v862_v11 = vld [vmem:[%s1580_s5] sm:$0x3] }
  0x66   :  { %815 = vmatpush.bf16.msrb.mxu3 %v1022_v17  ;;  %v1243_v17 = vld [vmem:[#allocation8 + $0x248] sm:$0xf0] }
  0x67   :  { %828 = vmatpush.bf16.msrb.mxu0 %v1086_v52  ;;  %v1246_v24 = vor.u32 %v1353_v16, %v1243_v17  ;;  %v324_v52 = vld [vmem:[%s1579_s4] sm:$0x3]  ;;  %v864_v16 = vperm.slane %v862_v11, 0  ;;  %v865_v17 = vperm.slane %v862_v11, 1 }
  0x68   :  { %v327_v61 = vperm.slane %v324_v52, 1 }
  0x9d   :  { %v178_v26 = vpop.f32.mrf.mxu0 }
  0x9e   :  { %v179_v29 = vadd.f32 %v178_v26, %v103_v22  ;;  %v1163_v22 = vld [vmem:[#allocation8 + $0x1a8] sm:$0xf0] }
  0x9f   :  { %v1166_v27 = vor.u32 %v1333_v20, %v1163_v22 }
  0xa0   :  { %v234_v33 = vmax.f32 %v179_v29, 0.0  ;;  %v1235_v29 = vld [vmem:[#allocation8 + $0x238] sm:$0xf0] }
  0xa1   :  { %v1238_v19 = vor.u32 %v1351_v28, %v1235_v29 }
  0xa2   :  { %v1556_v40 = vpack.c.bf16 %v234_v33, %v234_v33 }
  0xa4   :  { %738 = vmatmul.bf16.vlgmr.msra.gmra.mxu1 %v1556_v40 }
  0xa5   :  { %v204_v43 = vpop.f32.mrf.mxu2  ;;  %v180_v49 = vpop.f32.mrf.mxu0  ;;  %834 = vmatpush.bf16.msra.mxu1 %v1206_v37  ;;  %v1329_v37 = vld [vmem:[#allocation8 + $0x184] sm:$0xf] }
  0xa6   :  { %v191_v42 = vpop.f32.mrf.mxu3  ;;  %v205_v48 = vadd.f32 %v204_v43, %v105_v35  ;;  %v1349_v35 = vld [vmem:[#allocation8 + $0x224] sm:$0xf]  ;;  %v1150_v41 = vor.u32 %v1329_v37, %v1147_v38  ;;  %v1219_v43 = vld [vmem:[#allocation8 + $0x218] sm:$0xf0] }
  0xa7   :  { %v192_v47 = vadd.f32 %v191_v42, %v104_v34  ;;  %v1158_v34 = vor.u32 %v1331_v30, %v1155_v31  ;;  %v1230_v39 = vor.u32 %v1349_v35, %v1227_v36  ;;  %v1347_v42 = vld [vmem:[#allocation8 + $0x214] sm:$0xf] }
  0xa8   :  { %v236_v56 = vmax.f32 %v205_v48, 0.0 }
  0xa9   :  { %v235_v55 = vmax.f32 %v192_v47, 0.0  ;;  %835 = vmatpush.bf16.msra.mxu1 %v1198_v44  ;;  %v1222_v44 = vor.u32 %v1347_v42, %v1219_v43  ;;  %v1214_v47 = vor.u32 %v1345_v45, %v1211_v46 }
  0xaa   :  { %v1559_v59 = vpack.c.bf16 %v236_v56, %v236_v56  ;;  %v326_v56 = vperm.slane %v324_v52, 0 }
  0xab   :  { %v240_v58 = vpack.c.bf16 %v235_v55, %v235_v55 }
  0xac   :  { %764 = vmatmul.bf16.vlgmr.msra.gmra.mxu3 %v1559_v59 }
  0xad   :  { %751 = vmatmul.bf16.vlgmr.msrb.gmra.mxu2 %v240_v58  ;;  %v206_v3 = vpop.f32.mrf.mxu2  ;;  %v230_v5 = vpop.f32.mrf.mxu0  ;;  %836 = vmatpush.bf16.msra.mxu1 %v1190_v60 }
  0xae   :  { %v193_v2 = vpop.f32.mrf.mxu3  ;;  %847 = vmatpush.bf16.msrb.mxu2 %v1270_v57  ;;  %v231_v9 = vadd.f32 %v230_v5, %v107_v63 }
  0xb0   :  { %v238_v12 = vmax.f32 %v231_v9, 0.0 }
  0xb1   :  { %837 = vmatpush.bf16.msra.mxu1 %v1182_v6 }
  0xb2   :  { %848 = vmatpush.bf16.msrb.mxu2 %v1262_v4  ;;  %v243_v18 = vpack.c.bf16 %v238_v12, %v238_v12 }
  0xb4   :  { %790 = vmatmul.bf16.vlgmr.msrb.gmra.mxu1 %v243_v18 }
  0xb5   :  { %838 = vmatpush.bf16.msra.mxu1 %v1174_v15  ;;  %v232_v26 = vpop.f32.mrf.mxu0 }
  0xb6   :  { %v217_v23 = vpop.f32.mrf.mxu3  ;;  %849 = vmatpush.bf16.msrb.mxu2 %v1254_v13  ;;  %v1369_v26 = vld [vmem:[#allocation2] ss:$0 sm:$0xff] }
  0xb7   :  { %v218_v25 = vadd.f32 %v217_v23, %v106_v14 }
  0xb9   :  { %v237_v32 = vmax.f32 %v218_v25, 0.0  ;;  %839 = vmatpush.bf16.msra.mxu1 %v1166_v27 }
  0xba   :  { %850 = vmatpush.bf16.msrb.mxu2 %v1246_v24 }
  0xbb   :  { %v242_v33 = vpack.c.bf16 %v237_v32, %v237_v32 }
  0xbc   :  { %816 = vmatmul.bf16.vlgmr.msrb.gmra.mxu3 %v240_v58 }
  0xbd   :  { %777 = vmatmul.bf16.vlgmr.msra.gmra.mxu0 %v242_v33  ;;  %803 = vmatmul.bf16.vlgmr.msra.gmra.mxu2 %v1556_v40 }
  0xbe   :  { %v219_v21 = vpop.f32.mrf.mxu3  ;;  %851 = vmatpush.bf16.msrb.mxu2 %v1238_v19  ;;  %840 = vmatpush.bf16.msra.mxu1 %v1158_v34 }
  0xc2   :  { %852 = vmatpush.bf16.msrb.mxu2 %v1230_v39  ;;  %841 = vmatpush.bf16.msra.mxu1 %v1150_v41 }
  0xc5   :  { %842 = vmatmul.bf16.vlgmr.msra.gmra.mxu1 %v242_v33 }
  0xc6   :  { %853 = vmatpush.bf16.msrb.mxu2 %v1222_v44 }
  0xca   :  { %854 = vmatpush.bf16.msrb.mxu2 %v1214_v47 }
  0xcd   :  { %829 = vmatmul.bf16.vlgmr.msrb.gmra.mxu0 %v1559_v59  ;;  %855 = vmatmul.bf16.vlgmr.msrb.gmra.mxu2 %v243_v18 }
 0x121   :  { %v739_v40 = vpop.f32.mrf.mxu1 }
 0x122   :  { %v740_v58 = vadd.f32 %v739_v40, %v326_v56 }
 0x129   :  { %v741_v48 = vpop.f32.mrf.mxu1 }
 0x12f   :  { %v765_v50 = vpop.f32.mrf.mxu3 }
 0x130   :  { %v752_v49 = vpop.f32.mrf.mxu2 }
 0x131   :  { %v791_v51 = vpop.f32.mrf.mxu1  ;;  %v753_v63 = vadd.f32 %v752_v49, %v740_v58 }
 0x133   :  { %v766_v2 = vadd.f32 %v765_v50, %v753_v63 }
 0x137   :  { %v767_v54 = vpop.f32.mrf.mxu3 }
 0x138   :  { %v754_v53 = vpop.f32.mrf.mxu2 }
 0x139   :  { %v793_v57 = vpop.f32.mrf.mxu1 }
 0x13a   :  { %v778_v55 = vpop.f32.mrf.mxu0 }
 0x13b   :  { %v779_v4 = vadd.f32 %v778_v55, %v766_v2 }
 0x13d   :  { %v792_v10 = vadd.f32 %v791_v51, %v779_v4 }
 0x13f   :  { %v817_v62 = vpop.f32.mrf.mxu3  ;;  %v860_v14 = vmax.f32 %v792_v10, 0.0 }
 0x140   :  { %v804_v60 = vpop.f32.mrf.mxu2 }
 0x141   :  { %v805_v1 = vadd.f32 %v804_v60, %v327_v61  ;;  %v868_v22 = vmul.f32 %v864_v16, %v860_v14 }
 0x142   :  { %v780_v59 = vpop.f32.mrf.mxu0  ;;  %v843_v0 = vpop.f32.mrf.mxu1 }
 0x143   :  { %v818_v5 = vadd.f32 %v817_v62, %v805_v1 }
 0x147   :  { %v819_v6 = vpop.f32.mrf.mxu3 }
 0x148   :  { %v806_v3 = vpop.f32.mrf.mxu2 }
 0x14a   :  { %v830_v7 = vpop.f32.mrf.mxu0  ;;  %v845_v9 = vpop.f32.mrf.mxu1 }
 0x14b   :  { %v831_v8 = vadd.f32 %v830_v7, %v818_v5 }
 0x14d   :  { %v844_v12 = vadd.f32 %v843_v0, %v831_v8 }
 0x150   :  { %v856_v13 = vpop.f32.mrf.mxu2 }
 0x151   :  { %v857_v15 = vadd.f32 %v856_v13, %v844_v12 }
 0x152   :  { %v832_v18 = vpop.f32.mrf.mxu0 }
 0x153   :  { %v861_v20 = vmax.f32 %v857_v15, 0.0 }
 0x155   :  { %v869_v23 = vmul.f32 %v865_v17, %v861_v20 }
 0x157   :  { %v870_v24 = vadd.f32 %v869_v23, %v868_v22 }
 0x158   :  { %v858_v25 = vpop.f32.mrf.mxu2 }
 0x159   :  { %871 = vadd.xlane.f32.xlu0 %v870_v24 }
 0x1cc   :  { %v872_v27 = vpop.xlane.xlu0 %871 }
 0x1cd   :  { %v877_v28 = vadd.f32 %v1369_v26, %v872_v27 }
 0x1cf   :  { %v878_v29 = vsub.f32 0.0, %v877_v28 }
 0x1d1   :  { %v879_v30 = vmul.f32 1.442695, %v878_v29 }
 0x1d3   :  { %1370 = vpow2.f32 %v879_v30 }
 0x1d9   :  { %v1371_v31 = vpop.eup %1370 }
 0x1da   :  { %v881_v32 = vadd.f32 1.0, %v1371_v31 }
 0x1dc   :  { %1372 = vrcp.f32 %v881_v32  ;;  %v893_v35 = vand.u32 2147483648, %v881_v32  ;;  %v891_v37 = vand.u32 2147483647, %v881_v32  ;;  %vm887_vm2 = vweird.f32 %v881_v32 }
 0x1de   :  { %v894_v21 = vor.u32 1.1754944e-38, %v893_v35  ;;  %vm892_vm5 = vcmp.eq.f32.partialorder %v891_v37, 8.507059e+37 }
 0x1e2   :  { %v1373_v19 = vpop.eup %1372 }
 0x1e3   :  { %v883_v33 = vmul.f32 %v1373_v19, %v881_v32  ;;  %vm888_vm1 = vweird.f32 %v1373_v19 }
 0x1e4   :  { %vm889_vm3 = vmor %vm887_vm2, %vm888_vm1 }
 0x1e5   :  { %v884_v34 = vsub.f32 1.0, %v883_v33 }
 0x1e7   :  { %v885_v36 = vmul.f32 %v1373_v19, %v884_v34 }
 0x1e9   :  { %v886_v38 = vadd.f32 %v1373_v19, %v885_v36 }
 0x1eb   :  { %v890_v39 = vsel %vm889_vm3, %v1373_v19, %v886_v38 }
 0x1ec   :  { %v895_v41 = vsel %vm892_vm5, %v894_v21, %v890_v39 }
 0x1ed   :  { %898 = vst.msk [vmem:[%s1582_s7] sm:$0xff] %vm897_vm4, %v895_v41 }
 0x1ee   :  { %903 = vsyncpa [#allocation4], 1 }
 0x1ef   :  { %904 = vsyncpa [#allocation6], 1 }
 0x1f0   :  { %905 = vsyncpa [#allocation9], 1 }

</bundles_post_ra>
